<compile_context>
chip_gen: v5e
topology: v5e:2x2
jax: 0.10.0
libtpu: 0.0.40
codegen_flags: <defaults>
</compile_context>

<pallas_src>
import jax
import jax.numpy as jnp
from jax.experimental import pallas as pl
from jax.experimental.pallas import tpu as pltpu


def _round_up(x, m):
    return ((x + m - 1) // m) * m


def _cdiv(a, b):
    return -(-a // b)


def _vmem_cap_bytes():
    """Hardware-aware VMEM ceiling: ~75% of physical (64 MiB v7x, 128 MiB v5e/v6e)."""
    try:
        return int(0.75 * pltpu.get_tpu_info().vmem_capacity_bytes)
    except Exception:
        return 48 << 20      # conservative fallback (fits v7x)


def _resident_spec(block_shape, index_map):
    """BlockSpec for operands whose block never changes (weights / biases).

    Single-buffer them (Pallas double-buffers by default even for constant
    index maps) so the fused [Wo|Ws] weight only occupies one VMEM copy.
    """
    if hasattr(pl, "Buffered"):
        try:
            return pl.BlockSpec(block_shape, index_map,
                                pipeline_mode=pl.Buffered(1))
        except TypeError:
            pass
    return pl.BlockSpec(block_shape, index_map)


# ---------------------------------------------------------------------------
# Kernels
# ---------------------------------------------------------------------------
def _rnn_cell_kernel(x_ref, cx_ref, wi_ref, bi_ref, wos_ref, bos_ref,
                     h_ref, c_ref):
    hp = h_ref.shape[-1]                       # padded hidden dim (mult. of 128)
    # input_transform: tanh(x @ Wi + bi)  — bf16 MXU inputs, f32 accumulation.
    inp = jnp.tanh(
        jnp.dot(x_ref[...], wi_ref[...], preferred_element_type=jnp.float32)
        + bi_ref[...])
    c_pre = inp + cx_ref[...]                  # carry stays f32 (VPU add only)
    # fused output/state transforms: tanh(c_pre @ [Wo | Ws] + [bo | bs])
    hc = jnp.tanh(
        jnp.dot(c_pre.astype(wos_ref.dtype), wos_ref[...],
                preferred_element_type=jnp.float32)
        + bos_ref[...])
    h_ref[...] = hc[:, :hp].astype(h_ref.dtype)
    c_ref[...] = hc[:, hp:].astype(c_ref.dtype)


def _rnn_seq_kernel(x_ref, c0_ref, wi_ref, bi_ref, wos_ref, bos_ref,
                    h_ref, c_ref, c_carry):
    """block_t time steps per grid iteration; grid = (batch tiles, time blocks)."""
    # Reset the per-batch-tile carry at the first time block of this tile.
    @pl.when(pl.program_id(1) == 0)
    def _():
        c_carry[...] = c0_ref[...]

    block_t, block_b, _ = x_ref.shape
    hp = c_carry.shape[-1]

    # Resident weights (constant index maps) + hoisted bias broadcasts.
    wi = wi_ref[...]
    wos = wos_ref[...]
    bi = jnp.broadcast_to(bi_ref[...], (block_b, hp))
    bos = jnp.broadcast_to(bos_ref[...], (block_b, 2 * hp))

    def step(t, carry):
        inp = jnp.tanh(
            jnp.dot(x_ref[t], wi, preferred_element_type=jnp.float32) + bi)
        c_pre = inp + c_carry[...]
        hc = jnp.tanh(
            jnp.dot(c_pre.astype(wos.dtype), wos,
                    preferred_element_type=jnp.float32) + bos)
        c_next = hc[:, hp:]
        c_carry[...] = c_next                  # carried in full f32 precision
        h_ref[t] = hc[:, :hp].astype(h_ref.dtype)
        c_ref[t] = c_next.astype(c_ref.dtype)
        return carry

    jax.lax.fori_loop(0, block_t, step, 0, unroll=True)


# ---------------------------------------------------------------------------
# Host-side packing / tiling / wrappers
# ---------------------------------------------------------------------------
def pack_params(params, compute_dtype=jnp.bfloat16):
    """Pad + fuse the six parameters. Call ONCE; pass the result to the wrappers.

    params = (wi, bi, wo, bo, ws, bs); weights stored as (in, out) so the
    kernels compute x @ W (== x @ W_torch^T); biases are (1, H).
    Returns (wi_p, bi_p, wos_p, bos_p) with wos_p = [Wo | Ws] fused.
    """
    wi, bi, wo, bo, ws, bs = params
    I, H = wi.shape
    ip = _round_up(I, 128)
    hp = _round_up(H, 128)

    def pad2(a, r, c):
        return jnp.pad(a, ((0, r - a.shape[0]), (0, c - a.shape[1])))

    wi_p = pad2(wi, ip, hp).astype(compute_dtype)
    wos_p = jnp.concatenate(
        [pad2(wo, hp, hp), pad2(ws, hp, hp)], axis=1).astype(compute_dtype)
    bi_p = pad2(bi, 1, hp).astype(jnp.float32)
    bos_p = jnp.concatenate(
        [pad2(bo, 1, hp), pad2(bs, 1, hp)], axis=1).astype(jnp.float32)
    return wi_p, bi_p, wos_p, bos_p


def _batch_tiles(B, max_block=256):
    """Minimize batch padding; produce >= 2 tiles when B >= 16 (v7x megacore)."""
    bp8 = _round_up(B, 8)
    n_b = max(1, _cdiv(bp8, max_block))
    if bp8 >= 16:
        n_b = max(n_b, 2)
    block_b = _round_up(_cdiv(bp8, n_b), 8)
    n_b = _cdiv(bp8, block_b)
    return block_b, n_b, block_b * n_b


def _weights_vmem(ip, hp, isz):
    return ip * hp * isz + hp * 2 * hp * isz + 3 * hp * 4


def _cell_vmem_need(block_b, ip, hp, isz, osz):
    streams = 2 * (block_b * ip * isz          # x tile  (double buffered)
                   + block_b * hp * 4          # cx tile (f32)
                   + 2 * block_b * hp * osz)   # h / c tiles
    temps = 8 * block_b * hp * 4               # inp, c_pre, hc(2*hp), casts
    return _weights_vmem(ip, hp, isz) + streams + temps + (2 << 20)


def _seq_vmem_need(block_t, block_b, ip, hp, isz, osz):
    streams = 2 * (block_t * block_b * ip * isz
                   + block_b * hp * 4
                   + 2 * block_t * block_b * hp * osz)
    scratch = block_b * hp * 4                 # carry
    temps = 8 * block_b * hp * 4
    return _weights_vmem(ip, hp, isz) + streams + scratch + temps + (2 << 20)


def rnn_cell(x, hx, packed_params, *, out_dtype=jnp.bfloat16):
    """Single step: x (B, I), hx = (h, c) each (B, H) -> (h_next, c_next)."""
    _, cx = hx                                 # reference forward ignores h input
    wi_p, bi_p, wos_p, bos_p = packed_params
    B, I = x.shape
    H = cx.shape[1]
    ip, hp = wi_p.shape
    compute_dtype = wi_p.dtype
    isz = jnp.dtype(compute_dtype).itemsize
    osz = jnp.dtype(out_dtype).itemsize

    cap = _vmem_cap_bytes()
    block_b, n_b, bp = _batch_tiles(B)
    while block_b > 8 and _cell_vmem_need(block_b, ip, hp, isz, osz) > cap:
        block_b = _round_up(max(8, block_b // 2), 8)
        n_b = _cdiv(_round_up(B, 8), block_b)
        bp = n_b * block_b
    # TODO(synk): for hp >= ~2048 on v7x additionally tile the 2*hp output
    # columns of [Wo|Ws] so one weight tile stays well under 1/4 of VMEM.

    x_p = jnp.pad(x, ((0, bp - B), (0, ip - I))).astype(compute_dtype)
    cx_p = jnp.pad(cx, ((0, bp - B), (0, hp - H))).astype(jnp.float32)

    vmem_limit = int(max(16 << 20,
                         min(_cell_vmem_need(block_b, ip, hp, isz, osz), cap)))
    cost = pl.CostEstimate(
        flops=2 * bp * (ip * hp + hp * 2 * hp),
        transcendentals=3 * bp * hp,
        bytes_accessed=int(x_p.size * isz + cx_p.size * 4
                           + wi_p.size * isz + wos_p.size * isz
                           + (bi_p.size + bos_p.size) * 4
                           + 2 * bp * hp * osz))

    h_p, c_p = pl.pallas_call(
        _rnn_cell_kernel,
        out_shape=(jax.ShapeDtypeStruct((bp, hp), out_dtype),
                   jax.ShapeDtypeStruct((bp, hp), out_dtype)),
        grid_spec=pltpu.PrefetchScalarGridSpec(
            num_scalar_prefetch=0,
            grid=(n_b,),
            in_specs=[
                pl.BlockSpec((block_b, ip), lambda i: (i, 0)),     # x
                pl.BlockSpec((block_b, hp), lambda i: (i, 0)),     # cx (f32)
                _resident_spec((ip, hp), lambda i: (0, 0)),        # Wi
                _resident_spec((1, hp), lambda i: (0, 0)),         # bi
                _resident_spec((hp, 2 * hp), lambda i: (0, 0)),    # [Wo|Ws]
                _resident_spec((1, 2 * hp), lambda i: (0, 0)),     # [bo|bs]
            ],
            out_specs=(
                pl.BlockSpec((block_b, hp), lambda i: (i, 0)),     # h_next
                pl.BlockSpec((block_b, hp), lambda i: (i, 0)),     # c_next
            )),
        compiler_params=pltpu.CompilerParams(
            dimension_semantics=("parallel",),                     # batch tiles
            vmem_limit_bytes=vmem_limit),
        cost_estimate=cost,
    )(x_p, cx_p, wi_p, bi_p, wos_p, bos_p)

    return h_p[:B, :H], c_p[:B, :H]


def rnn_cell_sequence(xs, hx, packed_params, *, out_dtype=jnp.bfloat16,
                      block_t=8):
    """Scan the cell over a whole sequence in ONE pallas_call.

    xs: (T, B, I); hx = (h0, c0) each (B, H). Returns (hs, cs), each (T, B, H).
    grid = (batch tiles ["parallel"], time blocks ["arbitrary"]); weights stay
    resident in VMEM; the carry lives in a per-batch-tile VMEM scratch.
    """
    _, c0 = hx
    wi_p, bi_p, wos_p, bos_p = packed_params
    T, B, I = xs.shape
    H = c0.shape[1]
    ip, hp = wi_p.shape
    compute_dtype = wi_p.dtype
    isz = jnp.dtype(compute_dtype).itemsize
    osz = jnp.dtype(out_dtype).itemsize

    cap = _vmem_cap_bytes()
    block_b, n_b, bp = _batch_tiles(B)
    block_t = max(1, min(block_t, T))
    while block_t > 1 and _seq_vmem_need(block_t, block_b, ip, hp, isz, osz) > cap:
        block_t = max(1, block_t // 2)
    while block_b > 8 and _seq_vmem_need(block_t, block_b, ip, hp, isz, osz) > cap:
        block_b = _round_up(max(8, block_b // 2), 8)
        n_b = _cdiv(_round_up(B, 8), block_b)
        bp = n_b * block_b
    Tp = _round_up(T, block_t)
    n_t = Tp // block_t

    xs_p = jnp.pad(xs, ((0, Tp - T), (0, bp - B), (0, ip - I))).astype(compute_dtype)
    c0_p = jnp.pad(c0, ((0, bp - B), (0, hp - H))).astype(jnp.float32)

    vmem_limit = int(max(16 << 20,
                         min(_seq_vmem_need(block_t, block_b, ip, hp, isz, osz), cap)))
    cost = pl.CostEstimate(
        flops=2 * Tp * bp * (ip * hp + hp * 2 * hp),
        transcendentals=3 * Tp * bp * hp,
        bytes_accessed=int(xs_p.size * isz + c0_p.size * 4
                           + wi_p.size * isz + wos_p.size * isz
                           + (bi_p.size + bos_p.size) * 4
                           + 2 * Tp * bp * hp * osz))

    hs_p, cs_p = pl.pallas_call(
        _rnn_seq_kernel,
        out_shape=(jax.ShapeDtypeStruct((Tp, bp, hp), out_dtype),
                   jax.ShapeDtypeStruct((Tp, bp, hp), out_dtype)),
        grid_spec=pltpu.PrefetchScalarGridSpec(
            num_scalar_prefetch=0,
            grid=(n_b, n_t),                   # time LAST: carries the recurrence
            in_specs=[
                pl.BlockSpec((block_t, block_b, ip), lambda b, t: (t, b, 0)),  # x
                pl.BlockSpec((block_b, hp), lambda b, t: (b, 0)),              # c0 (f32)
                _resident_spec((ip, hp), lambda b, t: (0, 0)),                 # Wi
                _resident_spec((1, hp), lambda b, t: (0, 0)),                  # bi
                _resident_spec((hp, 2 * hp), lambda b, t: (0, 0)),             # [Wo|Ws]
                _resident_spec((1, 2 * hp), lambda b, t: (0, 0)),              # [bo|bs]
            ],
            out_specs=(
                pl.BlockSpec((block_t, block_b, hp), lambda b, t: (t, b, 0)),  # h_t
                pl.BlockSpec((block_t, block_b, hp), lambda b, t: (t, b, 0)),  # c_t
            ),
            scratch_shapes=[pltpu.VMEM((block_b, hp), jnp.float32)]),          # carry
        compiler_params=pltpu.CompilerParams(
            dimension_semantics=("parallel", "arbitrary"),
            vmem_limit_bytes=vmem_limit),
        cost_estimate=cost,
    )(xs_p, c0_p, wi_p, bi_p, wos_p, bos_p)

    return hs_p[:T, :B, :H], cs_p[:T, :B, :H]


# ---------------------------------------------------------------------------
# Parameter init + pure-JAX references
# ---------------------------------------------------------------------------
def init_params(key, input_dim, hidden_dim):
    """Deterministic synthetic parameters (PyTorch Linear-style uniform init)."""
    ks = jax.random.split(key, 6)

    def lin(kw, kb, fan_in, fan_out):
        bound = 1.0 / jnp.sqrt(fan_in)
        w = jax.random.uniform(kw, (fan_in, fan_out), jnp.float32, -bound, bound)
        b = jax.random.uniform(kb, (1, fan_out), jnp.float32, -bound, bound)
        return w, b

    wi, bi = lin(ks[0], ks[1], input_dim, hidden_dim)
    wo, bo = lin(ks[2], ks[3], hidden_dim, hidden_dim)
    ws, bs = lin(ks[4], ks[5], hidden_dim, hidden_dim)
    return (wi, bi, wo, bo, ws, bs)


def rnn_cell_reference(x, hx, params, compute_dtype=jnp.float32):
    """Pure-JAX mirror (carry stays f32; matmul inputs optionally bf16-rounded)."""
    _, cx = hx
    wi, bi, wo, bo, ws, bs = params
    cast = lambda a: a.astype(compute_dtype).astype(jnp.float32)
    inp = jnp.tanh(cast(x) @ cast(wi) + bi)
    c_pre = inp + cx.astype(jnp.float32)
    h_next = jnp.tanh(cast(c_pre) @ cast(wo) + bo)
    c_next = jnp.tanh(cast(c_pre) @ cast(ws) + bs)
    return h_next, c_next


def rnn_sequence_reference(xs, hx, params, compute_dtype=jnp.float32):
    """Scan mirror of the sequence kernel (carry kept in f32, like the kernel)."""
    wi, bi, wo, bo, ws, bs = params
    cast = lambda a: a.astype(compute_dtype).astype(jnp.float32)
    _, c0 = hx

    def step(c, x):
        inp = jnp.tanh(cast(x) @ cast(wi) + bi)
        c_pre = inp + c
        h = jnp.tanh(cast(c_pre) @ cast(wo) + bo)
        c_n = jnp.tanh(cast(c_pre) @ cast(ws) + bs)
        return c_n, (h, c_n)

    _, (hs, cs) = jax.lax.scan(step, c0.astype(jnp.float32), xs)
    return hs, cs


# ---------------------------------------------------------------------------
if __name__ == "__main__":
    batch, input_dim, hidden_dim, seq_len = 4, 16, 32, 8

    key = jax.random.PRNGKey(0)
    k_x, k_xs, k_h, k_c, k_p = jax.random.split(key, 5)

    x = jax.random.normal(k_x, (batch, input_dim), jnp.float32)
    xs = jax.random.normal(k_xs, (seq_len, batch, input_dim), jnp.float32)
    h0 = jax.random.normal(k_h, (batch, hidden_dim), jnp.float32)
    c0 = jax.random.normal(k_c, (batch, hidden_dim), jnp.float32)

    params = init_params(k_p, input_dim, hidden_dim)
    packed = pack_params(params)        # pad + [Wo|Ws] fusion + bf16 cast, ONCE

    # --- single step (== RNNCell.forward) ---
    h1, c1 = jax.jit(rnn_cell)(x, (h0, c0), packed)
    jax.block_until_ready((h1, c1))

    h1_mp, c1_mp = rnn_cell_reference(x, (h0, c0), params, jnp.bfloat16)
    h1_fp, c1_fp = rnn_cell_reference(x, (h0, c0), params, jnp.float32)
    h1f, c1f = h1.astype(jnp.float32), c1.astype(jnp.float32)
    assert jnp.allclose(h1f, h1_mp, atol=2e-2), "h mismatch vs bf16 mirror"
    assert jnp.allclose(c1f, c1_mp, atol=2e-2), "c mismatch vs bf16 mirror"
    assert jnp.allclose(h1f, h1_fp, atol=5e-2), "h drift vs f32 module semantics"
    assert jnp.allclose(c1f, c1_fp, atol=5e-2), "c drift vs f32 module semantics"

    # --- whole sequence in one pallas_call (time-blocked, weights resident) ---
    hs, cs = jax.jit(rnn_cell_sequence)(xs, (h0, c0), packed)
    jax.block_until_ready((hs, cs))

    hs_mp, cs_mp = rnn_sequence_reference(xs, (h0, c0), params, jnp.bfloat16)
    hs_fp, cs_fp = rnn_sequence_reference(xs, (h0, c0), params, jnp.float32)
    hsf, csf = hs.astype(jnp.float32), cs.astype(jnp.float32)
    assert jnp.allclose(hsf, hs_mp, atol=2e-2), "seq h mismatch vs bf16 mirror"
    assert jnp.allclose(csf, cs_mp, atol=2e-2), "seq c mismatch vs bf16 mirror"
    assert jnp.allclose(hsf, hs_fp, atol=7e-2), "seq h drift vs f32 module semantics"
    assert jnp.allclose(csf, cs_fp, atol=7e-2), "seq c drift vs f32 module semantics"

    print("KERNEL_OK")
</pallas_src>

<mosaic_0001>
module attributes {stable_mosaic.version = 11 : i64} {
  func.func @_rnn_cell_kernel(%arg0: i32, %arg1: memref<8x128xbf16, #tpu.memory_space<vmem>>, %arg2: memref<8x128xf32, #tpu.memory_space<vmem>>, %arg3: memref<128x128xbf16, #tpu.memory_space<vmem>>, %arg4: memref<1x128xf32, #tpu.memory_space<vmem>>, %arg5: memref<128x256xbf16, #tpu.memory_space<vmem>>, %arg6: memref<1x256xf32, #tpu.memory_space<vmem>>, %arg7: memref<8x128xbf16, #tpu.memory_space<vmem>>, %arg8: memref<8x128xbf16, #tpu.memory_space<vmem>>) attributes {dimension_semantics = [#tpu.dimension_semantics<parallel>], iteration_bounds = array<i64: 1>, scalar_prefetch = 0 : i64, scratch_operands = 0 : i64, tpu.core_type = #tpu.core_type<tc>, window_params = [{transform_indices = @transform_0, window_bounds = array<i64: 8, 128>}, {transform_indices = @transform_1, window_bounds = array<i64: 8, 128>}, {pipeline_mode = #tpu.pipeline_mode<synchronous>, transform_indices = @transform_2, window_bounds = array<i64: 128, 128>}, {pipeline_mode = #tpu.pipeline_mode<synchronous>, transform_indices = @transform_3, window_bounds = array<i64: 1, 128>}, {pipeline_mode = #tpu.pipeline_mode<synchronous>, transform_indices = @transform_4, window_bounds = array<i64: 128, 256>}, {pipeline_mode = #tpu.pipeline_mode<synchronous>, transform_indices = @transform_5, window_bounds = array<i64: 1, 256>}, {transform_indices = @transform_6, window_bounds = array<i64: 8, 128>}, {transform_indices = @transform_7, window_bounds = array<i64: 8, 128>}]} {
    %c0 = arith.constant 0 : index
    %c0_0 = arith.constant 0 : index
    %0 = vector.load %arg1[%c0, %c0_0] : memref<8x128xbf16, #tpu.memory_space<vmem>>, vector<8x128xbf16>
    %c0_1 = arith.constant 0 : index
    %c0_2 = arith.constant 0 : index
    %1 = vector.load %arg3[%c0_1, %c0_2] : memref<128x128xbf16, #tpu.memory_space<vmem>>, vector<128x128xbf16>
    %cst = arith.constant dense<0.000000e+00> : vector<8x128xf32>
    %2 = tpu.matmul %0, %1, %cst {dimension_numbers = #tpu.dot_dimension_numbers<[1], [0], [0], [1], [0, 0, 1, 1], [], []>} : vector<8x128xbf16>, vector<128x128xbf16>, vector<8x128xf32> -> vector<8x128xf32>
    %c0_3 = arith.constant 0 : index
    %c0_4 = arith.constant 0 : index
    %3 = vector.load %arg4[%c0_3, %c0_4] : memref<1x128xf32, #tpu.memory_space<vmem>>, vector<1x128xf32>
    %4 = vector.broadcast %3 : vector<1x128xf32> to vector<8x128xf32>
    %5 = arith.addf %2, %4 : vector<8x128xf32>
    %6 = math.tanh %5 : vector<8x128xf32>
    %c0_5 = arith.constant 0 : index
    %c0_6 = arith.constant 0 : index
    %7 = vector.load %arg2[%c0_5, %c0_6] : memref<8x128xf32, #tpu.memory_space<vmem>>, vector<8x128xf32>
    %8 = arith.addf %6, %7 : vector<8x128xf32>
    %9 = arith.truncf %8 : vector<8x128xf32> to vector<8x128xbf16>
    %c0_7 = arith.constant 0 : index
    %c0_8 = arith.constant 0 : index
    %10 = vector.load %arg5[%c0_7, %c0_8] : memref<128x256xbf16, #tpu.memory_space<vmem>>, vector<128x256xbf16>
    %cst_9 = arith.constant dense<0.000000e+00> : vector<8x256xf32>
    %11 = tpu.matmul %9, %10, %cst_9 {dimension_numbers = #tpu.dot_dimension_numbers<[1], [0], [0], [1], [0, 0, 1, 1], [], []>} : vector<8x128xbf16>, vector<128x256xbf16>, vector<8x256xf32> -> vector<8x256xf32>
    %c0_10 = arith.constant 0 : index
    %c0_11 = arith.constant 0 : index
    %12 = vector.load %arg6[%c0_10, %c0_11] : memref<1x256xf32, #tpu.memory_space<vmem>>, vector<1x256xf32>
    %13 = vector.broadcast %12 : vector<1x256xf32> to vector<8x256xf32>
    %14 = arith.addf %11, %13 : vector<8x256xf32>
    %15 = math.tanh %14 : vector<8x256xf32>
    %16 = vector.extract_strided_slice %15 {offsets = [0, 0], sizes = [8, 128], strides = [1, 1]} : vector<8x256xf32> to vector<8x128xf32>
    %17 = arith.truncf %16 : vector<8x128xf32> to vector<8x128xbf16>
    %c0_12 = arith.constant 0 : index
    %c0_13 = arith.constant 0 : index
    %18 = vector.load %arg7[%c0_12, %c0_13] : memref<8x128xbf16, #tpu.memory_space<vmem>>, vector<8x128xbf16>
    tpu.vector_store %arg7[%c0_12, %c0_13], %17 {strides = array<i32>} : memref<8x128xbf16, #tpu.memory_space<vmem>>, vector<8x128xbf16>,
    %19 = vector.extract_strided_slice %15 {offsets = [0, 128], sizes = [8, 128], strides = [1, 1]} : vector<8x256xf32> to vector<8x128xf32>
    %20 = arith.truncf %19 : vector<8x128xf32> to vector<8x128xbf16>
    %c0_14 = arith.constant 0 : index
    %c0_15 = arith.constant 0 : index
    %21 = vector.load %arg8[%c0_14, %c0_15] : memref<8x128xbf16, #tpu.memory_space<vmem>>, vector<8x128xbf16>
    tpu.vector_store %arg8[%c0_14, %c0_15], %20 {strides = array<i32>} : memref<8x128xbf16, #tpu.memory_space<vmem>>, vector<8x128xbf16>,
    return
  }
  func.func @transform_0(%arg0: i32) -> (i32, i32) {
    %c0_i32 = arith.constant 0 : i32
    %c0_i32_0 = arith.constant 0 : i32
    return %arg0, %c0_i32 : i32, i32
  }
  func.func @transform_1(%arg0: i32) -> (i32, i32) {
    %c0_i32 = arith.constant 0 : i32
    %c0_i32_0 = arith.constant 0 : i32
    return %arg0, %c0_i32 : i32, i32
  }
  func.func @transform_2(%arg0: i32) -> (i32, i32) {
    %c0_i32 = arith.constant 0 : i32
    %c0_i32_0 = arith.constant 0 : i32
    %c0_i32_1 = arith.constant 0 : i32
    return %c0_i32, %c0_i32_0 : i32, i32
  }
  func.func @transform_3(%arg0: i32) -> (i32, i32) {
    %c0_i32 = arith.constant 0 : i32
    %c0_i32_0 = arith.constant 0 : i32
    %c0_i32_1 = arith.constant 0 : i32
    return %c0_i32, %c0_i32_0 : i32, i32
  }
  func.func @transform_4(%arg0: i32) -> (i32, i32) {
    %c0_i32 = arith.constant 0 : i32
    %c0_i32_0 = arith.constant 0 : i32
    %c0_i32_1 = arith.constant 0 : i32
    return %c0_i32, %c0_i32_0 : i32, i32
  }
  func.func @transform_5(%arg0: i32) -> (i32, i32) {
    %c0_i32 = arith.constant 0 : i32
    %c0_i32_0 = arith.constant 0 : i32
    %c0_i32_1 = arith.constant 0 : i32
    return %c0_i32, %c0_i32_0 : i32, i32
  }
  func.func @transform_6(%arg0: i32) -> (i32, i32) {
    %c0_i32 = arith.constant 0 : i32
    %c0_i32_0 = arith.constant 0 : i32
    return %arg0, %c0_i32 : i32, i32
  }
  func.func @transform_7(%arg0: i32) -> (i32, i32) {
    %c0_i32 = arith.constant 0 : i32
    %c0_i32_0 = arith.constant 0 : i32
    return %arg0, %c0_i32 : i32, i32
  }
}

</mosaic_0001>

<bundles_post_ra>
// kernel: rnn_cell.1
= control target key start
LH: loop header
LB: loop body
LE: loop exit
PB: predicated region body
PF: predicated region fallthrough
CT: control target
= control target key end

     0   :  { %13 = vsyncpa [#allocation3], 0  ;;  %s542_s0 = inlined_call_operand.vmem [shape: bf16[8,128], index: 0, kind: input, shape index: {}]   ;;  %s543_s1 = inlined_call_operand.vmem [shape: f32[8,128], index: 1, kind: input, shape index: {}]   ;;  %s544_s2 = inlined_call_operand.hbm [shape: bf16[128,128], index: 2, kind: input, shape index: {}]   ;;  %s545_s3 = inlined_call_operand.vmem [shape: f32[1,128], index: 3, kind: input, shape index: {}]   ;;  %s546_s4 = inlined_call_operand.hbm [shape: bf16[128,256], index: 4, kind: input, shape index: {}]   ;;  %s547_s5 = inlined_call_operand.vmem [shape: f32[1,256], index: 5, kind: input, shape index: {}]   ;;  %s548_s6 = inlined_call_operand.vmem [shape: bf16[8,128], index: 6, kind: output, shape index: {0}]   ;;  %s549_s7 = inlined_call_operand.vmem [shape: bf16[8,128], index: 7, kind: output, shape index: {1}]  }
   0x1   :  { %s23_s26 = sshll.u32 %s544_s2, 4  ;;  %s24_s26 = int_to_ptr.hbm [resolvable:$true] %s23_s26 }
   0x2   :  { %14 = vsyncpa [#allocation5], 0  ;;  %s472_s27 = smov [#allocation2]   ;;  %s38_s8 = sshll.u32 %s546_s4, 4  ;;  %s39_s8 = int_to_ptr.hbm [resolvable:$true] %s38_s8 }
   0x3   :  { %s25_s28 = sshll.u32 %s472_s27, 4  ;;  %s473_s9 = smov 64   ;;  %s26_s28 = int_to_ptr.vmem [resolvable:$true] %s25_s28 }
   0x4   :  { %s474_s10 = smov 4   ;;  %s475_s11 = smov [#allocation4]  }
   0x5   :  { %31 = dma.hbm_to_vmem [thread:$0]  %s24_s26, 1024, %s26_s28, [#allocation3], %s473_s9, %s473_s9, %s474_s10  }
   0x6   :  { %s40_s12 = sshll.u32 %s475_s11, 4  ;;  %s476_s13 = smov 128   ;;  %s41_s12 = int_to_ptr.vmem [resolvable:$true] %s40_s12 }
   0x7   :  { %s477_s14 = smov 8  }
   0x8   :  { %46 = dma.hbm_to_vmem [thread:$0]  %s39_s8, 2048, %s41_s12, [#allocation5], %s476_s13, %s476_s13, %s477_s14  }
   0x9   :  { %468 = dma.done.wait [#allocation3], 1024  }
   0xa   :  { %469 = vsyncadd [#allocation3], 4294966272 }
   0xb   :  { %470 = dma.done.wait [#allocation5], 2048  }
   0xc   :  { %471 = vsyncadd [#allocation5], 4294965248  ;;  %v390_v0 = vld [vmem:[#allocation2 + $0x38] sm:$0xff]  ;;  %v389_v1 = vld [vmem:[#allocation2 + $0x30] sm:$0xff] }
   0xd   :  { %126 = vmatpush.bf16.msra.mxu0 %v390_v0  ;;  %v377_v2 = vld [vmem:[#allocation4 + $0x70] sm:$0xf]  ;;  %v406_v3 = vld [vmem:[#allocation4 + $0x74] sm:$0xf0]  ;;  %v405_v4 = vld [vmem:[#allocation4 + $0x74] sm:$0xf] }
   0xe   :  { %v378_v5 = vor.u32 %v406_v3, %v377_v2  ;;  %v379_v6 = vld [vmem:[#allocation4 + $0x78] sm:$0xf0]  ;;  %v369_v7 = vld [vmem:[#allocation4 + $0x60] sm:$0xf]  ;;  %v404_v8 = vld [vmem:[#allocation4 + $0x64] sm:$0xf0] }
   0xf   :  { %v382_v9 = vor.u32 %v405_v4, %v379_v6  ;;  %v403_v10 = vld [vmem:[#allocation4 + $0x64] sm:$0xf]  ;;  %v371_v11 = vld [vmem:[#allocation4 + $0x68] sm:$0xf0]  ;;  %v370_v13 = vor.u32 %v404_v8, %v369_v7  ;;  %v361_v15 = vld [vmem:[#allocation4 + $0x50] sm:$0xf] }
  0x10   :  { %v388_v12 = vld [vmem:[#allocation2 + $0x28] sm:$0xff]  ;;  %245 = vmatpush.bf16.msra.mxu1 %v378_v5  ;;  %v374_v14 = vor.u32 %v403_v10, %v371_v11  ;;  %v402_v16 = vld [vmem:[#allocation4 + $0x54] sm:$0xf0]  ;;  %v401_v17 = vld [vmem:[#allocation4 + $0x54] sm:$0xf] }
  0x11   :  { %127 = vmatpush.bf16.msra.mxu0 %v389_v1  ;;  %258 = vmatpush.bf16.msra.mxu2 %v382_v9  ;;  %v363_v18 = vld [vmem:[#allocation4 + $0x58] sm:$0xf0]  ;;  %v387_v19 = vld [vmem:[#allocation2 + $0x20] sm:$0xff]  ;;  %v362_v20 = vor.u32 %v402_v16, %v361_v15  ;;  %v400_v23 = vld [vmem:[#allocation4 + $0x44] sm:$0xf0] }
  0x12   :  { %v366_v21 = vor.u32 %v401_v17, %v363_v18  ;;  %v353_v22 = vld [vmem:[#allocation4 + $0x40] sm:$0xf]  ;;  %v399_v24 = vld [vmem:[#allocation4 + $0x44] sm:$0xf]  ;;  %v355_v25 = vld [vmem:[#allocation4 + $0x48] sm:$0xf0] }
  0x13   :  { %v386_v26 = vld [vmem:[#allocation2 + $0x18] sm:$0xff]  ;;  %v354_v27 = vor.u32 %v400_v23, %v353_v22  ;;  %v358_v28 = vor.u32 %v399_v24, %v355_v25  ;;  %v345_v29 = vld [vmem:[#allocation4 + $0x30] sm:$0xf]  ;;  %v397_v31 = vld [vmem:[#allocation4 + $0x34] sm:$0xf] }
  0x14   :  { %246 = vmatpush.bf16.msra.mxu1 %v370_v13  ;;  %v398_v30 = vld [vmem:[#allocation4 + $0x34] sm:$0xf0]  ;;  %v347_v32 = vld [vmem:[#allocation4 + $0x38] sm:$0xf0]  ;;  %v385_v33 = vld [vmem:[#allocation2 + $0x10] sm:$0xff] }
  0x15   :  { %128 = vmatpush.bf16.msra.mxu0 %v388_v12  ;;  %259 = vmatpush.bf16.msra.mxu2 %v374_v14  ;;  %v346_v34 = vor.u32 %v398_v30, %v345_v29  ;;  %v350_v35 = vor.u32 %v397_v31, %v347_v32  ;;  %v384_v36 = vld [vmem:[#allocation2 + $0x8] sm:$0xff]  ;;  %v383_v37 = vld [vmem:[#allocation2] sm:$0xff]  ;;  %v329_v45 = vld [vmem:[#allocation4 + $0x10] sm:$0xf] }
  0x16   :  { %v57_v38 = vld [vmem:[%s542_s0] sm:$0xf]  ;;  %v396_v40 = vld [vmem:[#allocation4 + $0x24] sm:$0xf0]  ;;  %v395_v41 = vld [vmem:[#allocation4 + $0x24] sm:$0xf] }
  0x17   :  { %v337_v39 = vld [vmem:[#allocation4 + $0x20] sm:$0xf]  ;;  %v339_v43 = vld [vmem:[#allocation4 + $0x28] sm:$0xf0]  ;;  %v394_v46 = vld [vmem:[#allocation4 + $0x14] sm:$0xf0] }
  0x18   :  { %247 = vmatpush.bf16.msra.mxu1 %v362_v20  ;;  %v338_v42 = vor.u32 %v396_v40, %v337_v39  ;;  %v342_v44 = vor.u32 %v395_v41, %v339_v43  ;;  %v393_v47 = vld [vmem:[#allocation4 + $0x14] sm:$0xf]  ;;  %v330_v48 = vor.u32 %v394_v46, %v329_v45  ;;  %v331_v49 = vld [vmem:[#allocation4 + $0x18] sm:$0xf0]  ;;  %v321_v51 = vld [vmem:[#allocation4] sm:$0xf] }
  0x19   :  { %129 = vmatpush.bf16.msra.mxu0 %v387_v19  ;;  %260 = vmatpush.bf16.msra.mxu2 %v366_v21  ;;  %v334_v50 = vor.u32 %v393_v47, %v331_v49  ;;  %v392_v52 = vld [vmem:[#allocation4 + $0x4] sm:$0xf0]  ;;  %v391_v53 = vld [vmem:[#allocation4 + $0x4] sm:$0xf]  ;;  %v323_v55 = vld [vmem:[#allocation4 + $0x8] sm:$0xf0] }
  0x1a   :  { %v322_v54 = vor.u32 %v392_v52, %v321_v51  ;;  %v326_v56 = vor.u32 %v391_v53, %v323_v55  ;;  %v413_v57 = vld [vmem:[%s545_s3] ss:$0 sm:$0xff] }
  0x1b   :  { %v140_v60 = vld [vmem:[%s543_s1] sm:$0xff] }
  0x1c   :  { %248 = vmatpush.bf16.msra.mxu1 %v354_v27  ;;  %v159_v1 = vld [vmem:[%s547_s5] sm:$0x3] }
  0x1d   :  { %130 = vmatpush.bf16.msra.mxu0 %v386_v26  ;;  %261 = vmatpush.bf16.msra.mxu2 %v358_v28  ;;  %v161_v2 = vperm.slane %v159_v1, 0  ;;  %v162_v5 = vperm.slane %v159_v1, 1 }
  0x20   :  { %249 = vmatpush.bf16.msra.mxu1 %v346_v34 }
  0x21   :  { %131 = vmatpush.bf16.msra.mxu0 %v385_v33  ;;  %262 = vmatpush.bf16.msra.mxu2 %v350_v35 }
  0x24   :  { %250 = vmatpush.bf16.msra.mxu1 %v338_v42 }
  0x25   :  { %132 = vmatpush.bf16.msra.mxu0 %v384_v36  ;;  %263 = vmatpush.bf16.msra.mxu2 %v342_v44 }
  0x28   :  { %251 = vmatpush.bf16.msra.mxu1 %v330_v48 }
  0x29   :  { %133 = vmatpush.bf16.msra.mxu0 %v383_v37  ;;  %264 = vmatpush.bf16.msra.mxu2 %v334_v50 }
  0x2c   :  { %134 = vmatmul.bf16.vlgmr.msra.gmra.mxu0 %v57_v38  ;;  %252 = vmatpush.bf16.msra.mxu1 %v322_v54 }
  0x2d   :  { %265 = vmatpush.bf16.msra.mxu2 %v326_v56 }
  0xa9   :  { %v135_v58 = vpop.f32.mrf.mxu0 }
  0xaa   :  { %v136_v59 = vadd.f32 %v413_v57, %v135_v58 }
  0xac   :  { %414 = vtanh.f32 %v136_v59 }
  0xb1   :  { %v137_v61 = vpop.f32.mrf.mxu0 }
  0xb2   :  { %v415_v62 = vpop.eup %414 }
  0xb3   :  { %v141_v63 = vadd.f32 %v415_v62, %v140_v60 }
  0xb5   :  { %v142_v0 = vpack.c.bf16 %v141_v63, %v141_v63 }
  0xb7   :  { %253 = vmatmul.bf16.vlgmr.msra.gmra.mxu1 %v142_v0  ;;  %266 = vmatmul.bf16.vlgmr.msra.gmra.mxu2 %v142_v0 }
 0x134   :  { %v254_v3 = vpop.f32.mrf.mxu1 }
 0x135   :  { %v255_v4 = vadd.f32 %v254_v3, %v161_v2 }
 0x137   :  { %416 = vtanh.f32 %v255_v4 }
 0x13a   :  { %v267_v6 = vpop.f32.mrf.mxu2 }
 0x13b   :  { %v268_v7 = vadd.f32 %v267_v6, %v162_v5 }
 0x13c   :  { %v256_v8 = vpop.f32.mrf.mxu1 }
 0x13d   :  { %v417_v9 = vpop.eup %416  ;;  %418 = vtanh.f32 %v268_v7 }
 0x13e   :  { %v273_v10 = vpack.c.bf16 %v417_v9, %v417_v9 }
 0x140   :  { %274 = vst [vmem:[%s548_s6] sm:$0xf] %v273_v10 }
 0x142   :  { %v269_v11 = vpop.f32.mrf.mxu2 }
 0x143   :  { %v419_v12 = vpop.eup %418 }
 0x144   :  { %v275_v13 = vpack.c.bf16 %v419_v12, %v419_v12 }
 0x146   :  { %276 = vst [vmem:[%s549_s7] sm:$0xf] %v275_v13 }
 0x147   :  { %285 = vsyncpa [#allocation3], 1 }
 0x148   :  { %286 = vsyncpa [#allocation5], 1 }

</bundles_post_ra>
